<compile_context>
chip_gen: v7x
topology: tpu7x:2x2x1
jax: 0.10.0
libtpu: 0.0.40
codegen_flags: <defaults>
</compile_context>

<pallas_src>
import jax
import jax.numpy as jnp
from jax.experimental import pallas as pl
from jax.experimental.pallas import tpu as pltpu


def _add_pos_kernel(seq_ref, pos_ref, out_ref):
    # seq_ref / out_ref: (TS, D) block for the current (s_tile, batch) step
    # pos_ref:           (TS, D) slab of the embedding table (rows s*TS..s*TS+TS)
    s = seq_ref[...].astype(jnp.float32)
    p = pos_ref[...].astype(jnp.float32)
    out_ref[...] = (s + p).astype(out_ref.dtype)


def _sublane_align(dtype) -> int:
    # second-to-last block dim alignment per dtype width
    return {4: 8, 2: 16, 1: 32}.get(jnp.dtype(dtype).itemsize, 8)


def learned_pos_embedding(seq: jax.Array, emb_weight: jax.Array,
                          *, donate_seq: bool = False) -> jax.Array:
    """seq: (B, S, D); emb_weight: (seq_len, D) with S <= seq_len."""
    B, S, D = seq.shape
    L, De = emb_weight.shape
    assert De == D, "embedding dim mismatch"
    assert L >= S, "sequence longer than embedding table"

    align = max(_sublane_align(seq.dtype), _sublane_align(emb_weight.dtype))
    seq_item = jnp.dtype(seq.dtype).itemsize
    emb_item = jnp.dtype(emb_weight.dtype).itemsize

    TARGET_TILE_BYTES = 2 * 1024 * 1024  # per seq block

    if S >= align and S % align == 0:
        # Main path: read the embedding table directly; tile the sequence axis.
        pos_src = emb_weight
        rows = max(align, TARGET_TILE_BYTES // max(1, D * seq_item))
        rows = (rows // align) * align
        ts = min(S, rows)
        while S % ts != 0:      # keep tiles exact (no ragged edge blocks)
            ts -= align
    else:
        # Tiny / unaligned S: slice out the rows we need so every block equals
        # the full array dims (always satisfies the (8,128) tiling constraint).
        pos_src = jax.lax.slice(emb_weight, (0, 0), (S, D))
        ts = S

    num_s = S // ts
    grid = (num_s, B)  # batch innermost -> pos tile stays VMEM-resident across batch

    # Scoped VMEM sized to the chosen tiles: seq in + out (double-buffered each)
    # plus the double-buffered pos tile, with headroom.  Capped at 64 MiB (v7x).
    seq_tile = ts * D * seq_item
    pos_tile = ts * D * emb_item
    vmem_needed = 4 * seq_tile + 2 * pos_tile
    vmem_limit = min(64 * 1024 * 1024,
                     max(32 * 1024 * 1024, int(1.5 * vmem_needed) + (1 << 20)))

    extra = {}
    if donate_seq:
        extra["input_output_aliases"] = {0: 0}  # write result over seq

    return pl.pallas_call(
        _add_pos_kernel,
        out_shape=jax.ShapeDtypeStruct((B, S, D), seq.dtype),
        grid_spec=pltpu.PrefetchScalarGridSpec(
            num_scalar_prefetch=0,
            grid=grid,
            in_specs=[
                # seq: (1, ts, D) block, batch dim squeezed out of the kernel ref
                pl.BlockSpec((None, ts, D), lambda s, b: (b, s, 0)),
                # pos: rows [s*ts, (s+1)*ts) of the table, shared across batch
                pl.BlockSpec((ts, D), lambda s, b: (s, 0)),
            ],
            out_specs=pl.BlockSpec((None, ts, D), lambda s, b: (b, s, 0)),
        ),
        compiler_params=pltpu.CompilerParams(
            dimension_semantics=("parallel", "parallel"),
            vmem_limit_bytes=vmem_limit,
        ),
        **extra,
    )(seq, pos_src)


if __name__ == "__main__":
    # Small shapes consistent with the module: batch=2, seq=8, hidden=32,
    # embedding table sized for max seq_len=16.
    B, S, D = 2, 8, 32
    SEQ_LEN = 16  # num_embeddings in nn.Embedding(seq_len, emb_dim)

    key = jax.random.PRNGKey(0)
    k_seq, k_emb = jax.random.split(key)

    seq = jax.random.normal(k_seq, (B, S, D), dtype=jnp.float32)
    emb_weight = jax.random.normal(k_emb, (SEQ_LEN, D), dtype=jnp.float32)

    out = learned_pos_embedding(seq, emb_weight)
    out = jax.block_until_ready(out)

    # Reference check in plain JAX.
    ref = seq + emb_weight[:S][None, :, :]
    assert out.shape == seq.shape
    assert jnp.allclose(out, ref, atol=1e-6), "mismatch vs reference"

    print("KERNEL_OK")
</pallas_src>

<mosaic_0001>
module attributes {stable_mosaic.version = 11 : i64} {
  func.func @_add_pos_kernel(%arg0: i32, %arg1: i32, %arg2: memref<1x8x32xf32, #tpu.memory_space<vmem>>, %arg3: memref<8x32xf32, #tpu.memory_space<vmem>>, %arg4: memref<1x8x32xf32, #tpu.memory_space<vmem>>) attributes {dimension_semantics = [#tpu.dimension_semantics<parallel>, #tpu.dimension_semantics<parallel>], iteration_bounds = array<i64: 1, 2>, scalar_prefetch = 0 : i64, scratch_operands = 0 : i64, tpu.core_type = #tpu.core_type<tc>, window_params = [{transform_indices = @transform_0, window_bounds = array<i64: 1, 8, 32>}, {transform_indices = @transform_1, window_bounds = array<i64: 8, 32>}, {transform_indices = @transform_2, window_bounds = array<i64: 1, 8, 32>}]} {
    %c0 = arith.constant 0 : index
    %c0_0 = arith.constant 0 : index
    %c0_1 = arith.constant 0 : index
    %0 = vector.load %arg2[%c0, %c0_0, %c0_1] : memref<1x8x32xf32, #tpu.memory_space<vmem>>, vector<1x8x32xf32>
    %1 = vector.shape_cast %0 : vector<1x8x32xf32> to vector<8x32xf32>
    %c0_2 = arith.constant 0 : index
    %c0_3 = arith.constant 0 : index
    %2 = vector.load %arg3[%c0_2, %c0_3] : memref<8x32xf32, #tpu.memory_space<vmem>>, vector<8x32xf32>
    %3 = arith.addf %1, %2 : vector<8x32xf32>
    %c0_4 = arith.constant 0 : index
    %c0_5 = arith.constant 0 : index
    %c0_6 = arith.constant 0 : index
    %4 = vector.load %arg4[%c0_4, %c0_5, %c0_6] : memref<1x8x32xf32, #tpu.memory_space<vmem>>, vector<1x8x32xf32>
    %5 = vector.shape_cast %4 : vector<1x8x32xf32> to vector<8x32xf32>
    %6 = vector.shape_cast %3 : vector<8x32xf32> to vector<1x8x32xf32>
    tpu.vector_store %arg4[%c0_4, %c0_5, %c0_6], %6 {strides = array<i32>} : memref<1x8x32xf32, #tpu.memory_space<vmem>>, vector<1x8x32xf32>,
    return
  }
  func.func @transform_0(%arg0: i32, %arg1: i32) -> (i32, i32, i32) {
    %c0_i32 = arith.constant 0 : i32
    %c0_i32_0 = arith.constant 0 : i32
    return %arg1, %arg0, %c0_i32 : i32, i32, i32
  }
  func.func @transform_1(%arg0: i32, %arg1: i32) -> (i32, i32) {
    %c0_i32 = arith.constant 0 : i32
    %c0_i32_0 = arith.constant 0 : i32
    return %arg0, %c0_i32 : i32, i32
  }
  func.func @transform_2(%arg0: i32, %arg1: i32) -> (i32, i32, i32) {
    %c0_i32 = arith.constant 0 : i32
    %c0_i32_0 = arith.constant 0 : i32
    return %arg1, %arg0, %c0_i32 : i32, i32, i32
  }
}

</mosaic_0001>

<bundles_post_ra>
// kernel: tpu_custom_call.1
= control target key start
LH: loop header
LB: loop body
LE: loop exit
PB: predicated region body
PF: predicated region fallthrough
CT: control target
= control target key end

     0   :  { %7 = vsyncpa [#allocation3], 0  ;;  %s779_s0 = inlined_call_operand.hbm [shape: f32[2,8,32], index: 0, kind: input, shape index: {}]   ;;  %s780_s1 = inlined_call_operand.hbm [shape: f32[16,32], index: 1, kind: input, shape index: {}]   ;;  %s781_s2 = inlined_call_operand.hbm [shape: f32[2,8,32], index: 2, kind: output, shape index: {}]  }
   0x1   :  { %9 = vsyncpa [#allocation3 + $0x1], 0 }
   0x2   :  { %10 = vsyncpa [#allocation6], 0 }
   0x3   :  { %11 = vsyncpa [#allocation4], 0 }
   0x4   :  { %13 = vsyncpa [#allocation4 + $0x1], 0  ;;  %s560_s9 = smov 0   ;;  %s562_s10 = smov 0  }
   0x5   :  { %s564_s11 = smov 0   ;;  %s566_s12 = smov 0  }
   0x6   :  { %s568_s13 = smov 0   ;;  %s570_s14 = smov 0  }
   0x7 LB: > { %s308_s15 = sadd.s32 4294967295, %s540_s14   ;;  %s309_s16 = sadd.s32 4294967294, %s540_s14   ;;  %s540_s14 = sphi %s570_s14, %s19_s14   ;;  %s536_s13 = sphi %s568_s13, %s806_s13   ;;  %s532_s12 = sphi %s566_s12, %s805_s12   ;;  %s528_s11 = sphi %s564_s11, %s804_s11   ;;  %s524_s10 = sphi %s562_s10, %s803_s10   ;;  %s520_s9 = sphi %s560_s9, %s802_s9  }
   0x8   : > { %p53_p0 = scmp.ne.s32.totalorder %s524_s10, %s520_s9  ;;  %p594_p1 = scmp.eq.s32.totalorder %s308_s15, 0 }
   0x9   : > { %p598_p2 = scmp.eq.s32.totalorder %s308_s15, 1  ;;  %p111_p3 = scmp.eq.s32.totalorder %s309_s16, 1 }
   0xa   : > { %s786_s17 = scalar_select %p594_p1, 1, 0 }
   0xb   : > { %s787_s18 = scalar_select %p598_p2, 1, 0 }
   0xc   : > { %p604_p4 = por %p594_p1, %p53_p0  ;;  %p310_p5 = scmp.ge.s32.totalorder %s540_s14, 1 }
   0xd   : > { %p609_p6 = por %p111_p3, %p53_p0  ;;  %p118_p7 = scmp.lt.s32.totalorder %s540_s14, 3 }
   0xe   : > { %s788_s19 = scalar_select %p604_p4, 1, 0 }
   0xf   : > { %s789_s20 = scalar_select %p609_p6, 1, 0 }
  0x10   : > { %p614_p8 = pnand %p310_p5, %p118_p7  ;;  %s542_s22 = smov [#allocation5]  }
  0x11   : > { %s133_s23 = sshll.u32 %s542_s22, 4  ;;  %s28_s25 = sadd.s32 1, %s536_s13  ;;  %s134_s23 = int_to_ptr.vmem [resolvable:$true] %s133_s23 }
  0x12   : > { %s790_s21 = scalar_select %p614_p8, 1, 0 }
  0x13   : > { %p331_p10 = pneg %p614_p8  ;;  %s40_s26 = sadd.s32 1, %s528_s11 }
  0x14   : > { %p629_p12 = scmp.ge.s32.totalorder %s28_s25, 2  ;;  %s396_s30 = scalar_lea.hbm %s780_s1, 128 }
  0x15   : > { %p623_p11 = pnand %p331_p10, %p594_p1  ;;  %p397_p13 = scmp.ne.s32.totalorder %s780_s1, %s396_s30 }
  0x16   : > { %s792_s27 = scalar_select %p629_p12, 1, 0 }
  0x17   : > { %p398_p0 = pneg %p623_p11  ;;  %s401_s7 = scalar_lea.hbm %s780_s1, 256 }
  0x18   : > { %p402_p7 = scmp.lt.u32.totalorder %s401_s7, %s396_s30  ;;  %p403_p10 = scmp.lt.u32.totalorder %s396_s30, %s780_s1 }
  0x19   : > { %p399_p3 = pnand %p398_p0, %p397_p13 }
  0x1a   : > { %p404_p9 = por %p403_p10, %p402_p7 }
  0x1b   : > { %p400_p5 = pneg %p399_p3 }
  0x1d   : > { %p405_p6 = pnand %p404_p9, %p400_p5 }
  0x1f   : > { %408 = shalt.err (!%p405_p6)
}
  0x20   : > { %s409_s16 = scalar_lea.vmem %s134_s23, 128  ;;  %p417_p2 = scmp.lt.s32.totalorder %s134_s23, %s134_s23 }
  0x21   : > { %p410_p1 = scmp.ne.s32.totalorder %s134_s23, %s409_s16  ;;  %p418_p12 = scmp.lt.s32.totalorder %s409_s16, %s409_s16 }
  0x23   : > { %p412_p4 = pnand %p410_p1, %p398_p0  ;;  %p419_p13 = por %p418_p12, %p417_p2 }
  0x25   : > { %p413_p8 = pneg %p412_p4 }
  0x27   : > { %p420_p3 = pnand %p419_p13, %p413_p8 }
  0x29   : > { %423 = shalt.err (!%p420_p3)
}
  0x2a   : > { %334 = dma.hbm_to_vmem [thread:$0]  (!%p623_p11), %s780_s1, 128, %s134_s23, [#allocation6]  }
  0x2b   : > { %p793_p1 = scmp.ne.s32.totalorder %s792_s27, 0  ;;  %p47_p2 = scmp.ne.s32.totalorder %s528_s11, %s524_s10 }
  0x2c   : > { %p48_p4 = scmp.eq.s32.totalorder %s540_s14, 0  ;;  %p344_p6 = scmp.lt.s32.totalorder %s540_s14, 2 }
  0x2d   : > { %s808_s25 = smov (%p793_p1, %s28_s25), 0  ;;  %p794_p12 = scmp.ne.s32.totalorder %s787_s18, 0 }
  0x2e   : > { %s35_s24 = ssub.s32 %s536_s13, %s808_s25  ;;  %p49_p9 = por %p48_p4, %p47_p2 }
  0x2f   : > { %p38_p8 = scmp.eq.s32.totalorder %s35_s24, 0  ;;  %p664_p0 = por %p794_p12, %p47_p2 }
  0x30   : > { %s144_s30 = sand.u32 1, %s528_s11   ;;  %s314_s27 = sshll.u32 %s536_s13, 7 }
  0x31   : > { %s672_s3 = scalar_select %p38_p8, %s528_s11, %s40_s26  }
  0x32   : > { %s313_s23 = sshll.u32 %s144_s30, 3  ;;  %s678_s6 = scalar_lea.hbm %s779_s0, %s314_s27 }
  0x33   : > { %s148_s18 = scalar_lea.vmem [#allocation2], %s313_s23  ;;  %p682_p11 = pnand %p344_p6, %p49_p9 }
  0x34   : > { %s156_s7 = sshll.u32 %s148_s18, 4  ;;  %s145_s26 = scalar_lea.sflag [#allocation3], %s144_s30  ;;  %s680_s7 = int_to_ptr.vmem [resolvable:$true] %s156_s7 }
  0x35   : > { %s424_s15 = scalar_lea.hbm %s678_s6, 128  ;;  %p426_p7 = pneg %p682_p11 }
  0x36   : > { %p425_p5 = scmp.ne.s32.totalorder %s678_s6, %s424_s15  ;;  %s429_s28 = scalar_lea.hbm %s779_s0, 256 }
  0x37   : > { %p430_p3 = scmp.lt.u32.totalorder %s678_s6, %s779_s0  ;;  %p431_p1 = scmp.lt.u32.totalorder %s429_s28, %s424_s15 }
  0x38   : > { %p427_p10 = pnand %p426_p7, %p425_p5  ;;  %p433_p4 = scmp.lt.u32.totalorder %s424_s15, %s678_s6 }
  0x39   : > { %p432_p2 = por %p431_p1, %p430_p3 }
  0x3a   : > { %p428_p13 = pneg %p427_p10 }
  0x3b   : > { %p434_p6 = por %p433_p4, %p432_p2 }
  0x3d   : > { %p435_p8 = pnand %p434_p6, %p428_p13 }
  0x3f   : > { %438 = shalt.err (!%p435_p8)
}
  0x40   : > { %s439_s30 = scalar_lea.vmem %s680_s7, 128  ;;  %s543_s27 = smov [#allocation2]  }
  0x41   : > { %p440_p9 = scmp.ne.s32.totalorder %s680_s7, %s439_s30  ;;  %s444_s4 = sshll.u32 %s543_s27, 4  ;;  %s445_s4 = int_to_ptr.vmem [resolvable:$false] %s444_s4 }
  0x42   : > { %s446_s5 = scalar_lea.vmem %s445_s4, 256  ;;  %p447_p10 = scmp.lt.s32.totalorder %s680_s7, %s445_s4 }
  0x43   : > { %p442_p12 = pnand %p440_p9, %p426_p7  ;;  %p448_p3 = scmp.lt.s32.totalorder %s446_s5, %s439_s30 }
  0x45   : > { %p443_p5 = pneg %p442_p12  ;;  %p449_p1 = por %p448_p3, %p447_p10 }
  0x47   : > { %p450_p2 = pnand %p449_p1, %p443_p5 }
  0x49   : > { %453 = shalt.err (!%p450_p2)
}
  0x4a   : > { %338 = dma.hbm_to_vmem [thread:$0]  (!%p682_p11), %s678_s6, 128, %s680_s7, %s145_s26  }
  0x4b   : > { %p797_p13 = scmp.ne.s32.totalorder %s790_s21, 0 }
  0x4c   : > { %s714_s18 = sand.u32 (!%p797_p13), 1, %s524_s10   ;;  %p798_p7 = scmp.ne.s32.totalorder (!%p797_p13), %s788_s19, 0 }
  0x4d   : > { %165 = sbr.rel (%p797_p13) target bundleno = 113 (0x71), region = 28  ;;  %s316_s15 = sshll.u32 (!%p797_p13), %s714_s18, 3 }
  0x4e   : > { %s168_s16 = scalar_lea.sflag (!%p797_p13), [#allocation3], %s714_s18  ;;  %s171_s22 = scalar_lea.vmem (!%p797_p13), [#allocation2], %s316_s15 }
  0x54   : > { %507 = dma.done.wait (%p798_p7), %s168_s16, 128  }
  0x55   : > { %509 = vsyncadd (%p798_p7), %s168_s16, 4294967168  ;;  %p799_p4 = scmp.ne.s32.totalorder %s786_s17, 0 }
  0x57   : > { %511 = dma.done.wait (%p799_p4), [#allocation6], 128  }
  0x58   : > { %513 = vsyncadd (%p799_p4), [#allocation6], 4294967168  ;;  %s195_s21 = scalar_lea.vmem [#allocation7], %s316_s15  ;;  %s320_s7 = sshll.u32 %s532_s12, 7  ;;  %v196_v0 = vld [vmem:[%s171_s22] sm:$0xff]  ;;  %v197_v1 = vld [vmem:[#allocation5] sm:$0xff] }
  0x59   : > { %s216_s6 = sshll.u32 %s195_s21, 4  ;;  %vm199_vm0 = vcmask 261120   ;;  %v198_v2 = vadd.f32 %v197_v1, %v196_v0  ;;  %s732_s17 = scalar_lea.hbm %s781_s2, %s320_s7  ;;  %s727_s6 = int_to_ptr.vmem [resolvable:$true] %s216_s6 }
  0x5a   : > { %s202_s26 = scalar_lea.sflag [#allocation4], %s714_s18  ;;  %s454_s28 = scalar_lea.vmem %s727_s6, 128 }
  0x5b   : > { %200 = vst.msk [vmem:[%s195_s21] sm:$0xff] %vm199_vm0, %v198_v2  ;;  %p455_p11 = scmp.ne.s32.totalorder %s727_s6, %s454_s28  ;;  %s544_s12 = smov [#allocation7]  }
  0x5c   : > { %s458_s24 = sshll.u32 %s544_s12, 4  ;;  %s459_s24 = int_to_ptr.vmem [resolvable:$false] %s458_s24 }
  0x5d   : > { %p456_p6 = pnand %p455_p11, %p664_p0  ;;  %s460_s23 = scalar_lea.vmem %s459_s24, 256 }
  0x5e   : > { %p461_p9 = scmp.lt.s32.totalorder %s727_s6, %s459_s24  ;;  %p462_p12 = scmp.lt.s32.totalorder %s460_s23, %s454_s28 }
  0x5f   : > { %p457_p8 = pneg %p456_p6 }
  0x60   : > { %p463_p5 = por %p462_p12, %p461_p9 }
  0x62   : > { %p464_p10 = pnand %p463_p5, %p457_p8 }
  0x64   : > { %467 = shalt.err (!%p464_p10)
}
  0x65   : > { %s468_s30 = scalar_lea.hbm %s732_s17, 128  ;;  %s472_s5 = scalar_lea.hbm %s781_s2, 256 }
  0x66   : > { %p469_p3 = scmp.ne.s32.totalorder %s732_s17, %s468_s30  ;;  %p473_p13 = scmp.lt.u32.totalorder %s732_s17, %s781_s2 }
  0x67   : > { %p474_p7 = scmp.lt.u32.totalorder %s472_s5, %s468_s30  ;;  %p476_p11 = scmp.lt.u32.totalorder %s468_s30, %s732_s17 }
  0x68   : > { %p470_p1 = pnand %p469_p3, %p664_p0 }
  0x69   : > { %p475_p4 = por %p474_p7, %p473_p13 }
  0x6a   : > { %p471_p2 = pneg %p470_p1 }
  0x6b   : > { %p477_p6 = por %p476_p11, %p475_p4 }
  0x6d   : > { %p478_p8 = pnand %p477_p6, %p471_p2 }
  0x6f   : > { %481 = shalt.err (!%p478_p8)
}
  0x70   : > { %329 = dma.vmem_to_hbm [thread:$0]  (%p664_p0), %s727_s6, 128, %s732_s17, %s202_s26  }
  0x71 PF: > { %s228_s16 = sand.u32 1, %s520_s9   ;;  %p800_p9 = scmp.ne.s32.totalorder %s789_s20, 0 }
  0x72   : > { %p801_p12 = scmp.ge.s32.totalorder %s540_s14, 2  ;;  %s229_s22 = scalar_lea.sflag [#allocation4], %s228_s16 }
  0x74   : > { %p340_p5 = pnand %p801_p12, %p800_p9 }
  0x76   : > { %515 = dma.done.wait (!%p340_p5), %s229_s22, 128  }
  0x77   : > { %517 = vsyncadd (!%p340_p5), %s229_s22, 4294967168  ;;  %s19_s14 = sadd.s32 1, %s540_s14   ;;  %s802_s9 = smov %s524_s10 }
  0x78   : > { %p16_p10 = scmp.ge.s32.totalorder %s19_s14, 4   ;;  %s803_s10 = smov %s528_s11 }
  0x79   : > { %s804_s11 = smov %s672_s3  ;;  %s805_s12 = smov %s536_s13 }
  0x7a   : > { %s806_s13 = smov %s808_s25  ;;  %18 = sbr.rel (!%p16_p10) target bundleno = 7 (0x7), region = 78 }
  0x81   :  { %234 = vsyncpa [#allocation3], 1 }
  0x82   :  { %236 = vsyncpa [#allocation3 + $0x1], 1 }
  0x83   :  { %237 = vsyncpa [#allocation6], 1 }
  0x84   :  { %238 = vsyncpa [#allocation4], 1 }
  0x85   :  { %240 = vsyncpa [#allocation4 + $0x1], 1 }

</bundles_post_ra>
